<compile_context>
chip_gen: v7x
topology: tpu7x:2x2x1
jax: 0.10.0
libtpu: 0.0.40
codegen_flags: <defaults>
</compile_context>

<pallas_src>
import functools

import jax
import jax.numpy as jnp
from jax.experimental import pallas as pl
from jax.experimental.pallas import tpu as pltpu

_EPS = 1e-5  # nn.BatchNorm1d default


def _fused_bn_kernel(x_ref, w_ref, b_ref, o_ref, sum_ref, sumsq_ref, stats_ref,
                     *, inv_n, eps, d, width, tile_rows, last_valid):
    """grid = (2, num_tiles).  Pass 0 accumulates per-lane sum / sum-of-squares
    over the row tiles and computes (scale, shift); pass 1 applies them."""
    p = pl.program_id(0)       # pass axis: 0 = stats, 1 = normalize
    i = pl.program_id(1)       # row-tile axis
    nt = pl.num_programs(1)

    @pl.when(p == 0)
    def _stats_pass():
        @pl.when(i == 0)
        def _():
            sum_ref[...] = jnp.zeros_like(sum_ref)
            sumsq_ref[...] = jnp.zeros_like(sumsq_ref)

        x = x_ref[...].astype(jnp.float32)
        if last_valid < tile_rows:
            # Partial last block: rows >= last_valid hold garbage read past the
            # array end -> zero them (stats-neutral, divisor is the true N).
            row_ids = jax.lax.broadcasted_iota(jnp.int32, (tile_rows, 1), 0)
            limit = jnp.where(i == nt - 1, last_valid, tile_rows)
            x = jnp.where(row_ids < limit, x, 0.0)

        if tile_rows % 8 == 0:
            # Per-tile fold down to 8 sublanes with pure VALU adds; the
            # cross-sublane (XLU) 8->1 reduce is deferred to the epilogue.
            xr = x.reshape(tile_rows // 8, 8, width)
            sum_ref[...] += jnp.sum(xr, axis=0)
            sumsq_ref[...] += jnp.sum(xr * xr, axis=0)
        else:
            sum_ref[0:1, :] += jnp.sum(x, axis=0, keepdims=True)
            sumsq_ref[0:1, :] += jnp.sum(x * x, axis=0, keepdims=True)

        @pl.when(i == nt - 1)
        def _epilogue():
            s = jnp.sum(sum_ref[...], axis=0, keepdims=True)
            sq = jnp.sum(sumsq_ref[...], axis=0, keepdims=True)
            # Fold the (width // d) interleaved channel groups with XLU
            # roll-adds; this also broadcasts the totals back to every group.
            sh = width // 2
            while sh >= d:  # trace-time loop: log2(pack_factor) rolls
                s = s + pltpu.roll(s, sh, axis=1)
                sq = sq + pltpu.roll(sq, sh, axis=1)
                sh //= 2
            mean = s * inv_n
            # TODO(synk): E[x^2] - mean^2 can cancel for very large |mean|*N;
            # clamped to >= 0 here (adequate for typical audio features).
            var = jnp.maximum(sq * inv_n - mean * mean, 0.0)
            inv_std = jax.lax.rsqrt(var + eps)
            scale = inv_std * w_ref[...].astype(jnp.float32)
            shift = b_ref[...].astype(jnp.float32) - mean * scale
            stats_ref[0:1, :] = scale
            stats_ref[1:2, :] = shift

    @pl.when(p == 1)
    def _normalize_pass():
        x = x_ref[...].astype(jnp.float32)
        y = x * stats_ref[0:1, :] + stats_ref[1:2, :]
        o_ref[...] = y.astype(o_ref.dtype)


def _vmem_capacity_bytes():
    try:
        cap = getattr(pltpu.get_tpu_info(), "vmem_capacity_bytes", None)
        if cap:
            return int(cap)
    except Exception:
        pass
    return 64 << 20  # conservative (v7x-sized) fallback


def kw_batchnorm_plus_forward(audio_feats, weight, bias, *, tile_rows=4096,
                              force_streaming=False):
    """audio_feats: (B, T, D); weight, bias: (D,). Returns (B, T, D)."""
    assert audio_feats.ndim == 3
    B, T, D = audio_feats.shape
    N = B * T

    # Pack P element-rows per 128-lane vreg row when D divides 128.
    P = 128 // D if (D < 128 and 128 % D == 0) else 1
    W = D * P

    x2d = audio_feats.reshape(N, D)
    pad_rows = (-N) % P
    if pad_rows:
        # Rare ragged case: at most P-1 zero rows so the lane-dense reshape is
        # valid.  Zero rows are stats-neutral (divisor below is the true N).
        x2d = jnp.pad(x2d, ((0, pad_rows), (0, 0)))
    n_packed = (N + pad_rows) // P
    x_packed = x2d.reshape(n_packed, W)

    w_tiled = jnp.tile(weight.astype(jnp.float32).reshape(1, D), (1, P))
    b_tiled = jnp.tile(bias.astype(jnp.float32).reshape(1, D), (1, P))

    itemsize = jnp.dtype(audio_feats.dtype).itemsize
    slab_bytes = n_packed * W * itemsize * 2            # input + output slabs
    cap = _vmem_capacity_bytes()
    # Account for Pallas double-buffering each spec (2x), plus headroom.
    resident = (not force_streaming) and (2 * slab_bytes + (4 << 20)
                                          <= int(0.85 * cap))

    if resident:
        tile_rows_eff = n_packed                        # whole slab is 1 block
        vmem_limit = int(0.9 * cap)
    else:
        tile_rows_eff = max(8, (tile_rows // 8) * 8)
        if tile_rows_eff >= n_packed:
            tile_rows_eff = n_packed                    # single full-extent block
        vmem_limit = None                               # scoped default is plenty

    num_tiles = pl.cdiv(n_packed, tile_rows_eff)
    last_valid = n_packed - (num_tiles - 1) * tile_rows_eff

    cp_kwargs = dict(dimension_semantics=("arbitrary", "arbitrary"))
    if vmem_limit is not None:
        cp_kwargs["vmem_limit_bytes"] = vmem_limit

    kernel = functools.partial(
        _fused_bn_kernel, inv_n=1.0 / N, eps=_EPS, d=D, width=W,
        tile_rows=tile_rows_eff, last_valid=last_valid)

    out_packed = pl.pallas_call(
        kernel,
        out_shape=jax.ShapeDtypeStruct((n_packed, W), audio_feats.dtype),
        grid=(2, num_tiles),
        in_specs=[
            pl.BlockSpec((tile_rows_eff, W), lambda p, i: (i, 0)),
            pl.BlockSpec((1, W), lambda p, i: (0, 0)),
            pl.BlockSpec((1, W), lambda p, i: (0, 0)),
        ],
        # Pin the output to block 0 during the stats pass (p == 0) so nothing
        # is flushed to HBM until pass 1 writes real data.
        out_specs=pl.BlockSpec((tile_rows_eff, W), lambda p, i: (p * i, 0)),
        scratch_shapes=[
            pltpu.VMEM((8, W), jnp.float32),   # partial sums (8 sublanes)
            pltpu.VMEM((8, W), jnp.float32),   # partial sums of squares
            pltpu.VMEM((2, W), jnp.float32),   # (scale, shift), VMEM-resident
        ],
        compiler_params=pltpu.CompilerParams(**cp_kwargs),
    )(x_packed, w_tiled, b_tiled)

    if pad_rows:
        out2d = out_packed.reshape(n_packed * P, D)[:N]   # rare ragged case only
    else:
        out2d = out_packed.reshape(N, D)                   # free reshape
    return out2d.reshape(B, T, D)


class KwBatchNormPlus:
    """JAX mirror of Kw_BatchNorm_plus (training-mode forward)."""
    # TODO(synk): running_mean/running_var tracking and eval-mode BatchNorm1d
    # are intentionally omitted (this forward uses batch statistics).

    def __init__(self, kw_dim, init_bias, init_scale, std_scale=1, learnable=True):
        assert std_scale > 0
        self.kw_dim = kw_dim
        self.std_scale = std_scale
        self.learnable = learnable  # grad semantics not needed for forward
        # init_bn: weight = init_scale * std_scale, bias = init_bias
        self.weight = (init_scale * std_scale).astype(jnp.float32)
        self.bias = init_bias.astype(jnp.float32)

    def __call__(self, audio_feats, **kwargs):
        assert audio_feats.ndim == 3
        return kw_batchnorm_plus_forward(audio_feats, self.weight, self.bias,
                                         **kwargs)


def _reference(audio_feats, weight, bias):
    xf = audio_feats.astype(jnp.float32)
    mean = jnp.mean(xf, axis=(0, 1), keepdims=True)
    var = jnp.mean((xf - mean) ** 2, axis=(0, 1), keepdims=True)
    return (xf - mean) / jnp.sqrt(var + _EPS) * weight + bias


if __name__ == "__main__":
    key = jax.random.PRNGKey(0)
    B, T, D = 2, 8, 32  # kw_dim = 32

    k1, k2, k3, k4, k5 = jax.random.split(key, 5)
    # Deterministic "token embedding" statistics used to init the BN affine.
    init_bias = jax.random.normal(k1, (D,), dtype=jnp.float32) * 0.1
    init_scale = jnp.abs(jax.random.normal(k2, (D,), dtype=jnp.float32)) + 0.5
    std_scale = 2.0

    module = KwBatchNormPlus(D, init_bias, init_scale, std_scale=std_scale)

    # 1) Small-shape check (VMEM-resident single-block path).
    audio_feats = jax.random.normal(k3, (B, T, D), dtype=jnp.float32)
    out = jax.block_until_ready(module(audio_feats))
    ref = _reference(audio_feats, module.weight, module.bias)
    assert out.shape == (B, T, D)
    assert jnp.allclose(out, ref, atol=1e-4, rtol=1e-4), (
        float(jnp.max(jnp.abs(out - ref))))

    # 2) Larger sequence (still resident) check.
    B2, T2 = 4, 1500
    audio_feats2 = jax.random.normal(k4, (B2, T2, D), dtype=jnp.float32)
    out2 = jax.block_until_ready(module(audio_feats2))
    ref2 = _reference(audio_feats2, module.weight, module.bias)
    assert out2.shape == (B2, T2, D)
    assert jnp.allclose(out2, ref2, atol=1e-4, rtol=1e-4), (
        float(jnp.max(jnp.abs(out2 - ref2))))

    # 3) Forced streaming path: multi-tile grid + masked partial last block.
    out3 = jax.block_until_ready(
        module(audio_feats2, tile_rows=128, force_streaming=True))
    assert jnp.allclose(out3, ref2, atol=1e-4, rtol=1e-4), (
        float(jnp.max(jnp.abs(out3 - ref2))))

    # 4) Ragged B*T (not a multiple of the pack factor) path.
    B3, T3 = 3, 7
    audio_feats3 = jax.random.normal(k5, (B3, T3, D), dtype=jnp.float32)
    out4 = jax.block_until_ready(module(audio_feats3))
    ref4 = _reference(audio_feats3, module.weight, module.bias)
    assert out4.shape == (B3, T3, D)
    assert jnp.allclose(out4, ref4, atol=1e-4, rtol=1e-4), (
        float(jnp.max(jnp.abs(out4 - ref4))))

    print("KERNEL_OK")
</pallas_src>

<mosaic_0001>
module attributes {stable_mosaic.version = 11 : i64} {
  func.func @_fused_bn_kernel(%arg0: i32, %arg1: i32, %arg2: memref<4x128xf32, #tpu.memory_space<vmem>>, %arg3: memref<1x128xf32, #tpu.memory_space<vmem>>, %arg4: memref<1x128xf32, #tpu.memory_space<vmem>>, %arg5: memref<4x128xf32, #tpu.memory_space<vmem>>, %arg6: memref<8x128xf32, #tpu.memory_space<vmem>>, %arg7: memref<8x128xf32, #tpu.memory_space<vmem>>, %arg8: memref<2x128xf32, #tpu.memory_space<vmem>>) attributes {dimension_semantics = [#tpu.dimension_semantics<arbitrary>, #tpu.dimension_semantics<arbitrary>], iteration_bounds = array<i64: 2, 1>, scalar_prefetch = 0 : i64, scratch_operands = 3 : i64, tpu.core_type = #tpu.core_type<tc>, window_params = [{transform_indices = @transform_0, window_bounds = array<i64: 4, 128>}, {pipeline_mode = #tpu.pipeline_mode<synchronous>, transform_indices = @transform_1, window_bounds = array<i64: 1, 128>}, {pipeline_mode = #tpu.pipeline_mode<synchronous>, transform_indices = @transform_2, window_bounds = array<i64: 1, 128>}, {transform_indices = @transform_3, window_bounds = array<i64: 4, 128>}]} {
    %c0_i32 = arith.constant 0 : i32
    %0 = arith.cmpi eq, %arg0, %c0_i32 : i32
    %1 = arith.extui %0 : i1 to i32
    %c0_i32_0 = arith.constant 0 : i32
    %2 = arith.cmpi ne, %1, %c0_i32_0 : i32
    scf.if %2 {
      %c0_i32_2 = arith.constant 0 : i32
      %6 = arith.cmpi eq, %arg1, %c0_i32_2 : i32
      %7 = arith.extui %6 : i1 to i32
      %c0_i32_3 = arith.constant 0 : i32
      %8 = arith.cmpi ne, %7, %c0_i32_3 : i32
      scf.if %8 {
        %cst_16 = arith.constant 0.000000e+00 : f32
        %24 = vector.broadcast %cst_16 : f32 to vector<8x128xf32>
        %c0_17 = arith.constant 0 : index
        %c0_18 = arith.constant 0 : index
        %25 = vector.load %arg6[%c0_17, %c0_18] : memref<8x128xf32, #tpu.memory_space<vmem>>, vector<8x128xf32>
        tpu.vector_store %arg6[%c0_17, %c0_18], %24 {strides = array<i32>} : memref<8x128xf32, #tpu.memory_space<vmem>>, vector<8x128xf32>,
        %cst_19 = arith.constant 0.000000e+00 : f32
        %26 = vector.broadcast %cst_19 : f32 to vector<8x128xf32>
        %c0_20 = arith.constant 0 : index
        %c0_21 = arith.constant 0 : index
        %27 = vector.load %arg7[%c0_20, %c0_21] : memref<8x128xf32, #tpu.memory_space<vmem>>, vector<8x128xf32>
        tpu.vector_store %arg7[%c0_20, %c0_21], %26 {strides = array<i32>} : memref<8x128xf32, #tpu.memory_space<vmem>>, vector<8x128xf32>,
      } else {
      }
      %c0 = arith.constant 0 : index
      %c0_4 = arith.constant 0 : index
      %9 = vector.load %arg2[%c0, %c0_4] : memref<4x128xf32, #tpu.memory_space<vmem>>, vector<4x128xf32>
      %c0_5 = arith.constant 0 : index
      %c0_6 = arith.constant 0 : index
      %10 = vector.load %arg6[%c0_5, %c0_6] : memref<8x128xf32, #tpu.memory_space<vmem>>, vector<1x128xf32>
      %cst = arith.constant dense<0.000000e+00> : vector<128xf32>
      %11 = vector.multi_reduction <add>, %9, %cst [0] : vector<4x128xf32> to vector<128xf32>
      %12 = vector.shape_cast %11 : vector<128xf32> to vector<1x128xf32>
      %13 = arith.addf %10, %12 : vector<1x128xf32>
      %c0_7 = arith.constant 0 : index
      %c0_8 = arith.constant 0 : index
      %14 = vector.load %arg6[%c0_7, %c0_8] : memref<8x128xf32, #tpu.memory_space<vmem>>, vector<1x128xf32>
      tpu.vector_store %arg6[%c0_7, %c0_8], %13 {strides = array<i32>} : memref<8x128xf32, #tpu.memory_space<vmem>>, vector<1x128xf32>,
      %c0_9 = arith.constant 0 : index
      %c0_10 = arith.constant 0 : index
      %15 = vector.load %arg7[%c0_9, %c0_10] : memref<8x128xf32, #tpu.memory_space<vmem>>, vector<1x128xf32>
      %16 = arith.mulf %9, %9 : vector<4x128xf32>
      %cst_11 = arith.constant dense<0.000000e+00> : vector<128xf32>
      %17 = vector.multi_reduction <add>, %16, %cst_11 [0] : vector<4x128xf32> to vector<128xf32>
      %18 = vector.shape_cast %17 : vector<128xf32> to vector<1x128xf32>
      %19 = arith.addf %15, %18 : vector<1x128xf32>
      %c0_12 = arith.constant 0 : index
      %c0_13 = arith.constant 0 : index
      %20 = vector.load %arg7[%c0_12, %c0_13] : memref<8x128xf32, #tpu.memory_space<vmem>>, vector<1x128xf32>
      tpu.vector_store %arg7[%c0_12, %c0_13], %19 {strides = array<i32>} : memref<8x128xf32, #tpu.memory_space<vmem>>, vector<1x128xf32>,
      %c0_i32_14 = arith.constant 0 : i32
      %21 = arith.cmpi eq, %arg1, %c0_i32_14 : i32
      %22 = arith.extui %21 : i1 to i32
      %c0_i32_15 = arith.constant 0 : i32
      %23 = arith.cmpi ne, %22, %c0_i32_15 : i32
      scf.if %23 {
        %c0_16 = arith.constant 0 : index
        %c0_17 = arith.constant 0 : index
        %24 = vector.load %arg6[%c0_16, %c0_17] : memref<8x128xf32, #tpu.memory_space<vmem>>, vector<8x128xf32>
        %cst_18 = arith.constant dense<0.000000e+00> : vector<128xf32>
        %25 = vector.multi_reduction <add>, %24, %cst_18 [0] : vector<8x128xf32> to vector<128xf32>
        %26 = vector.shape_cast %25 : vector<128xf32> to vector<1x128xf32>
        %c0_19 = arith.constant 0 : index
        %c0_20 = arith.constant 0 : index
        %27 = vector.load %arg7[%c0_19, %c0_20] : memref<8x128xf32, #tpu.memory_space<vmem>>, vector<8x128xf32>
        %cst_21 = arith.constant dense<0.000000e+00> : vector<128xf32>
        %28 = vector.multi_reduction <add>, %27, %cst_21 [0] : vector<8x128xf32> to vector<128xf32>
        %29 = vector.shape_cast %28 : vector<128xf32> to vector<1x128xf32>
        %c64_i32 = arith.constant 64 : i32
        %30 = tpu.dynamic_rotate %26 by %c64_i32 dim 1 : vector<1x128xf32>, i32 -> vector<1x128xf32>
        %31 = arith.addf %26, %30 : vector<1x128xf32>
        %c64_i32_22 = arith.constant 64 : i32
        %32 = tpu.dynamic_rotate %29 by %c64_i32_22 dim 1 : vector<1x128xf32>, i32 -> vector<1x128xf32>
        %33 = arith.addf %29, %32 : vector<1x128xf32>
        %c32_i32 = arith.constant 32 : i32
        %34 = tpu.dynamic_rotate %31 by %c32_i32 dim 1 : vector<1x128xf32>, i32 -> vector<1x128xf32>
        %35 = arith.addf %31, %34 : vector<1x128xf32>
        %c32_i32_23 = arith.constant 32 : i32
        %36 = tpu.dynamic_rotate %33 by %c32_i32_23 dim 1 : vector<1x128xf32>, i32 -> vector<1x128xf32>
        %37 = arith.addf %33, %36 : vector<1x128xf32>
        %cst_24 = arith.constant 6.250000e-02 : f32
        %38 = vector.broadcast %cst_24 : f32 to vector<1x128xf32>
        %39 = arith.mulf %35, %38 : vector<1x128xf32>
        %cst_25 = arith.constant 6.250000e-02 : f32
        %40 = vector.broadcast %cst_25 : f32 to vector<1x128xf32>
        %41 = arith.mulf %37, %40 : vector<1x128xf32>
        %42 = arith.mulf %39, %39 : vector<1x128xf32>
        %43 = arith.subf %41, %42 : vector<1x128xf32>
        %cst_26 = arith.constant 0.000000e+00 : f32
        %44 = vector.broadcast %cst_26 : f32 to vector<1x128xf32>
        %45 = arith.maximumf %43, %44 : vector<1x128xf32>
        %cst_27 = arith.constant 9.99999974E-6 : f32
        %46 = vector.broadcast %cst_27 : f32 to vector<1x128xf32>
        %47 = arith.addf %45, %46 : vector<1x128xf32>
        %48 = math.rsqrt %47 : vector<1x128xf32>
        %c0_28 = arith.constant 0 : index
        %c0_29 = arith.constant 0 : index
        %49 = vector.load %arg3[%c0_28, %c0_29] : memref<1x128xf32, #tpu.memory_space<vmem>>, vector<1x128xf32>
        %50 = arith.mulf %48, %49 : vector<1x128xf32>
        %c0_30 = arith.constant 0 : index
        %c0_31 = arith.constant 0 : index
        %51 = vector.load %arg4[%c0_30, %c0_31] : memref<1x128xf32, #tpu.memory_space<vmem>>, vector<1x128xf32>
        %52 = arith.mulf %39, %50 : vector<1x128xf32>
        %53 = arith.subf %51, %52 : vector<1x128xf32>
        %c0_32 = arith.constant 0 : index
        %c0_33 = arith.constant 0 : index
        %54 = vector.load %arg8[%c0_32, %c0_33] : memref<2x128xf32, #tpu.memory_space<vmem>>, vector<1x128xf32>
        tpu.vector_store %arg8[%c0_32, %c0_33], %50 {strides = array<i32>} : memref<2x128xf32, #tpu.memory_space<vmem>>, vector<1x128xf32>,
        %c1 = arith.constant 1 : index
        %c0_34 = arith.constant 0 : index
        %55 = vector.load %arg8[%c1, %c0_34] : memref<2x128xf32, #tpu.memory_space<vmem>>, vector<1x128xf32>
        tpu.vector_store %arg8[%c1, %c0_34], %53 {strides = array<i32>} : memref<2x128xf32, #tpu.memory_space<vmem>>, vector<1x128xf32>,
      } else {
      }
    } else {
    }
    %c1_i32 = arith.constant 1 : i32
    %3 = arith.cmpi eq, %arg0, %c1_i32 : i32
    %4 = arith.extui %3 : i1 to i32
    %c0_i32_1 = arith.constant 0 : i32
    %5 = arith.cmpi ne, %4, %c0_i32_1 : i32
    scf.if %5 {
      %c0 = arith.constant 0 : index
      %c0_2 = arith.constant 0 : index
      %6 = vector.load %arg2[%c0, %c0_2] : memref<4x128xf32, #tpu.memory_space<vmem>>, vector<4x128xf32>
      %c0_3 = arith.constant 0 : index
      %c0_4 = arith.constant 0 : index
      %7 = vector.load %arg8[%c0_3, %c0_4] : memref<2x128xf32, #tpu.memory_space<vmem>>, vector<1x128xf32>
      %8 = vector.broadcast %7 : vector<1x128xf32> to vector<4x128xf32>
      %9 = arith.mulf %6, %8 : vector<4x128xf32>
      %c1 = arith.constant 1 : index
      %c0_5 = arith.constant 0 : index
      %10 = vector.load %arg8[%c1, %c0_5] : memref<2x128xf32, #tpu.memory_space<vmem>>, vector<1x128xf32>
      %11 = vector.broadcast %10 : vector<1x128xf32> to vector<4x128xf32>
      %12 = arith.addf %9, %11 : vector<4x128xf32>
      %c0_6 = arith.constant 0 : index
      %c0_7 = arith.constant 0 : index
      %13 = vector.load %arg5[%c0_6, %c0_7] : memref<4x128xf32, #tpu.memory_space<vmem>>, vector<4x128xf32>
      tpu.vector_store %arg5[%c0_6, %c0_7], %12 {strides = array<i32>} : memref<4x128xf32, #tpu.memory_space<vmem>>, vector<4x128xf32>,
    } else {
    }
    return
  }
  func.func @transform_0(%arg0: i32, %arg1: i32) -> (i32, i32) {
    %c0_i32 = arith.constant 0 : i32
    %c0_i32_0 = arith.constant 0 : i32
    return %arg1, %c0_i32 : i32, i32
  }
  func.func @transform_1(%arg0: i32, %arg1: i32) -> (i32, i32) {
    %c0_i32 = arith.constant 0 : i32
    %c0_i32_0 = arith.constant 0 : i32
    %c0_i32_1 = arith.constant 0 : i32
    return %c0_i32, %c0_i32_0 : i32, i32
  }
  func.func @transform_2(%arg0: i32, %arg1: i32) -> (i32, i32) {
    %c0_i32 = arith.constant 0 : i32
    %c0_i32_0 = arith.constant 0 : i32
    %c0_i32_1 = arith.constant 0 : i32
    return %c0_i32, %c0_i32_0 : i32, i32
  }
  func.func @transform_3(%arg0: i32, %arg1: i32) -> (i32, i32) {
    %0 = arith.muli %arg0, %arg1 : i32
    %c0_i32 = arith.constant 0 : i32
    %c0_i32_0 = arith.constant 0 : i32
    return %0, %c0_i32 : i32, i32
  }
}

</mosaic_0001>

<bundles_post_ra>
// kernel: tpu_custom_call.1
= control target key start
LH: loop header
LB: loop body
LE: loop exit
PB: predicated region body
PF: predicated region fallthrough
CT: control target
= control target key end

     0   :  { %8 = vsyncpa [#allocation6], 0  ;;  %s645_s0 = inlined_call_operand.hbm [shape: f32[4,128], index: 0, kind: input, shape index: {}]   ;;  %s646_s1 = inlined_call_operand.vmem [shape: f32[1,128], index: 1, kind: input, shape index: {}]   ;;  %s647_s2 = inlined_call_operand.vmem [shape: f32[1,128], index: 2, kind: input, shape index: {}]   ;;  %s648_s3 = inlined_call_operand.hbm [shape: f32[4,128], index: 3, kind: output, shape index: {}]  }
   0x1   :  { %9 = vsyncpa [#allocation7], 0 }
   0x2   :  { %11 = vsyncpa [#allocation7 + $0x1], 0  ;;  %s539_s12 = smov 0   ;;  %s541_s13 = smov 0  }
   0x3   :  { %s543_s14 = smov 0  }
   0x4 LB: > { %s362_s15 = sadd.s32 4294967295, %s512_s14   ;;  %s363_s16 = sadd.s32 4294967294, %s512_s14   ;;  %s512_s14 = sphi %s543_s14, %s17_s14   ;;  %s508_s13 = sphi %s541_s13, %s659_s13   ;;  %s504_s12 = sphi %s539_s12, %s658_s12  }
   0x5   : > { %s29_s17 = sadd.s32 1, %s508_s13  ;;  %p364_p0 = scmp.ge.s32.totalorder %s512_s14, 1 }
   0x6   : > { %p31_p1 = scmp.ge.s32.totalorder %s29_s17, 2  ;;  %p130_p2 = scmp.lt.s32.totalorder %s512_s14, 3 }
   0x7   : > { %p561_p3 = scmp.eq.s32.totalorder %s362_s15, 0  ;;  %s514_s20 = smov [#allocation5]  }
   0x8   : > { %s661_s17 = smov (%p31_p1, %s29_s17), 0  ;;  %p567_p4 = pnand %p364_p0, %p130_p2 }
   0x9   : > { %s652_s18 = scalar_select %p561_p3, 1, 0 }
   0xa   : > { %s653_s19 = scalar_select %p567_p4, 1, 0 }
   0xb   : > { %s145_s21 = sshll.u32 %s514_s20, 4  ;;  %p384_p5 = pneg %p567_p4  ;;  %s146_s21 = int_to_ptr.vmem [resolvable:$true] %s145_s21 }
   0xc   : > { %s428_s25 = scalar_lea.hbm %s645_s0, 64 }
   0xd   : > { %p575_p6 = pnand %p561_p3, %p384_p5  ;;  %p429_p7 = scmp.ne.s32.totalorder %s645_s0, %s428_s25 }
   0xe   : > { %p435_p11 = scmp.lt.u32.totalorder %s428_s25, %s645_s0 }
   0xf   : > { %p430_p8 = pneg %p575_p6 }
  0x11   : > { %p431_p9 = pnand %p430_p8, %p429_p7 }
  0x13   : > { %p432_p10 = pneg %p431_p9 }
  0x15   : > { %p437_p12 = pnand %p435_p11, %p432_p10 }
  0x17   : > { %440 = shalt.err (!%p437_p12)
}
  0x18   : > { %s441_s30 = scalar_lea.vmem %s146_s21, 64  ;;  %p449_p2 = scmp.lt.s32.totalorder %s146_s21, %s146_s21 }
  0x19   : > { %p442_p13 = scmp.ne.s32.totalorder %s146_s21, %s441_s30  ;;  %p450_p5 = scmp.lt.s32.totalorder %s441_s30, %s441_s30 }
  0x1b   : > { %p444_p0 = pnand %p442_p13, %p430_p8  ;;  %p451_p3 = por %p450_p5, %p449_p2 }
  0x1d   : > { %p445_p1 = pneg %p444_p0 }
  0x1f   : > { %p452_p4 = pnand %p451_p3, %p445_p1 }
  0x21   : > { %455 = shalt.err (!%p452_p4)
}
  0x22   : > { %387 = dma.hbm_to_vmem [thread:$0]  (!%p575_p6), %s645_s0, 64, %s146_s21, [#allocation6]  }
  0x23   : > { %p655_p7 = scmp.ne.s32.totalorder %s653_s19, 0 }
  0x24   : > { %p656_p9 = scmp.ne.s32.totalorder (!%p655_p7), %s652_s18, 0 }
  0x25   : > { %164 = sbr.rel (%p655_p7) target bundleno = 379 (0x17b), region = 32 }
  0x2c   : > { %495 = dma.done.wait (%p656_p9), [#allocation6], 64  }
  0x2d   : > { %497 = vsyncadd (%p656_p9), [#allocation6], 4294967232  ;;  %p368_p8 = scmp.ne.s32.totalorder %s504_s12, 0 }
  0x2e   : > { %v194_v0 = vld [vmem:[#allocation5] sm:$0xf] (!%p368_p8)  ;;  %vm196_vm0 = vcmask (!%p368_p8), 1043456   ;;  %v515_v1 = vmov (!%p368_p8), 0.0   ;;  %s516_s6 = smov (!%p368_p8), 64   ;;  %s517_s7 = smov (!%p368_p8), 32  }
  0x2f   : > { %187 = sbr.rel (%p368_p8) target bundleno = 346 (0x15a), region = 40  ;;  %192 = vst [vmem:[#allocation2] sm:$0xff] (!%p368_p8), %v515_v1  ;;  %193 = vst [vmem:[#allocation3] sm:$0xff] (!%p368_p8), %v515_v1  ;;  %v197_v2 = vsel (!%p368_p8), %vm196_vm0, %v194_v0, 0.0  ;;  %v207_v3 = vmul.f32 (!%p368_p8), %v194_v0, %v194_v0  ;;  %v253_v49 = vld [vmem:[%s646_s1] sm:$0x1] (!%p368_p8) }
  0x30   : > { %v198_v4 = vrot.slane (!%p368_p8), %v197_v2, 4  ;;  %v255_v52 = vld [vmem:[%s647_s2] sm:$0x1] (!%p368_p8) }
  0x31   : > { %v208_v5 = vsel (!%p368_p8), %vm196_vm0, %v207_v3, 0.0 }
  0x32   : > { %v199_v6 = vadd.f32 (!%p368_p8), %v198_v4, %v197_v2  ;;  %v209_v7 = vrot.slane (!%p368_p8), %v208_v5, 4 }
  0x34   : > { %v200_v8 = vrot.slane (!%p368_p8), %v199_v6, 2  ;;  %v210_v9 = vadd.f32 (!%p368_p8), %v209_v7, %v208_v5 }
  0x36   : > { %v201_v10 = vadd.f32 %v200_v8, %v199_v6  ;;  %v211_v11 = vrot.slane %v210_v9, 2  ;;  %v195_v14 = vld [vmem:[#allocation2] sm:$0x1]  ;;  %v206_v17 = vld [vmem:[#allocation3] sm:$0x1] }
  0x38   : > { %v202_v12 = vrot.slane %v201_v10, 1  ;;  %v212_v13 = vadd.f32 %v211_v11, %v210_v9 }
  0x3a   : > { %v203_v15 = vadd.f32 %v202_v12, %v201_v10  ;;  %v213_v16 = vrot.slane %v212_v13, 1 }
  0x3c   : > { %v204_v18 = vadd.f32 %v203_v15, %v195_v14  ;;  %v214_v19 = vadd.f32 %v213_v16, %v212_v13 }
  0x3e   : > { %205 = vst [vmem:[#allocation2] sm:$0x1] %v204_v18  ;;  %v215_v20 = vadd.f32 %v214_v19, %v206_v17 }
  0x40   : > { %216 = vst [vmem:[#allocation3] sm:$0x1] %v215_v20 }
  0x45   : > { %v220_v21 = vld [vmem:[#allocation2] sm:$0xff] }
  0x46   : > { %v221_v22 = vrot.slane %v220_v21, 4 }
  0x47   : > { %v227_v23 = vld [vmem:[#allocation3] sm:$0xff] }
  0x48   : > { %v222_v24 = vadd.f32 %v221_v22, %v220_v21  ;;  %v228_v25 = vrot.slane %v227_v23, 4 }
  0x4a   : > { %v223_v26 = vrot.slane %v222_v24, 2  ;;  %v229_v27 = vadd.f32 %v228_v25, %v227_v23 }
  0x4c   : > { %v224_v28 = vadd.f32 %v223_v26, %v222_v24  ;;  %v230_v29 = vrot.slane %v229_v27, 2 }
  0x4e   : > { %v225_v30 = vrot.slane %v224_v28, 1  ;;  %v231_v31 = vadd.f32 %v230_v29, %v229_v27 }
  0x50   : > { %v226_v32 = vadd.f32 %v225_v30, %v224_v28  ;;  %v232_v33 = vrot.slane %v231_v31, 1 }
  0x52   : > { %234 = vrot.lane.b32.xlu0 %v226_v32, %s516_s6  ;;  %v233_v34 = vadd.f32 %v232_v33, %v231_v31 }
  0x56   : > { %237 = vrot.lane.b32.xlu0 %v233_v34, %s516_s6 }
  0xc4   : > { %v235_v35 = vpop.permute.xlu0 %234 }
  0xc5   : > { %v236_v36 = vadd.f32 %v235_v35, %v226_v32 }
  0xc7   : > { %240 = vrot.lane.b32.xlu1 %v236_v36, %s517_s7 }
  0xc8   : > { %v238_v37 = vpop.permute.xlu0 %237 }
  0xc9   : > { %v239_v38 = vadd.f32 %v238_v37, %v233_v34 }
  0xcb   : > { %243 = vrot.lane.b32.xlu1 %v239_v38, %s517_s7 }
 0x139   : > { %v241_v39 = vpop.permute.xlu1 %240 }
 0x13a   : > { %v242_v40 = vadd.f32 %v241_v39, %v236_v36 }
 0x13c   : > { %v246_v41 = vmul.f32 0.0625, %v242_v40 }
 0x13d   : > { %v244_v42 = vpop.permute.xlu1 %243 }
 0x13e   : > { %v245_v43 = vadd.f32 %v244_v42, %v239_v38  ;;  %v248_v44 = vmul.f32 %v246_v41, %v246_v41 }
 0x140   : > { %v247_v45 = vmul.f32 0.0625, %v245_v43 }
 0x142   : > { %v249_v46 = vsub.f32 %v247_v45, %v248_v44 }
 0x144   : > { %v250_v47 = vmax.f32 %v249_v46, 0.0 }
 0x146   : > { %v251_v48 = vadd.f32 1e-05, %v250_v47 }
 0x148   : > { %426 = vrsqrt.f32 %v251_v48 }
 0x152   : > { %v427_v50 = vpop.eup %426 }
 0x153   : > { %v254_v51 = vmul.f32 %v427_v50, %v253_v49 }
 0x155   : > { %v256_v53 = vmul.f32 %v254_v51, %v246_v41  ;;  %258 = vst [vmem:[#allocation4] sm:$0x1] %v254_v51 }
 0x157   : > { %v257_v54 = vsub.f32 %v255_v52, %v256_v53 }
 0x159   : > { %259 = vst [vmem:[#allocation4 + $0x1] sm:$0x1] %v257_v54 }
 0x15a PF: > { %p369_p3 = scmp.ne.s32.totalorder %s504_s12, 1 }
 0x15b   : > { %v264_v55 = vld [vmem:[#allocation5] sm:$0xf] (!%p369_p3) }
 0x15c   : > { %263 = sbr.rel (%p369_p3) target bundleno = 356 (0x164), region = 52  ;;  %v370_v56 = vld [vmem:[#allocation4] ss:$0 sm:$0xff] (!%p369_p3) }
 0x15d   : > { %v270_v58 = vmul.f32 (!%p369_p3), %v370_v56, %v264_v55 }
 0x160   : > { %v371_v57 = vld [vmem:[#allocation4 + $0x1] ss:$0 sm:$0xff] (!%p369_p3) }
 0x161   : > { %v276_v59 = vadd.f32 (!%p369_p3), %v371_v57, %v270_v58 }
 0x163   : > { %277 = vst [vmem:[#allocation8] sm:$0xf] %v276_v59 }
 0x164 PF: > { %p611_p4 = scmp.eq.s32.totalorder %s362_s15, 1  ;;  %s518_s19 = smov [#allocation8]  }
 0x165   : > { %s293_s20 = sshll.u32 %s518_s19, 4  ;;  %s294_s20 = int_to_ptr.vmem [resolvable:$true] %s293_s20 }
 0x166   : > { %s456_s21 = scalar_lea.vmem %s294_s20, 64  ;;  %s462_s12 = scalar_lea.vmem %s294_s20, 128 }
 0x167   : > { %p457_p6 = scmp.ne.s32.totalorder %s294_s20, %s456_s21  ;;  %p463_p12 = scmp.lt.s32.totalorder %s294_s20, %s294_s20 }
 0x168   : > { %p464_p13 = scmp.lt.s32.totalorder %s462_s12, %s456_s21 }
 0x169   : > { %p458_p10 = pnand %p457_p6, %p611_p4 }
 0x16a   : > { %p465_p0 = por %p464_p13, %p463_p12 }
 0x16b   : > { %p459_p11 = pneg %p458_p10 }
 0x16d   : > { %p466_p1 = pnand %p465_p0, %p459_p11 }
 0x16f   : > { %469 = shalt.err (!%p466_p1)
}
 0x170   : > { %s470_s23 = scalar_lea.hbm %s648_s3, 64 }
 0x171   : > { %p471_p2 = scmp.ne.s32.totalorder %s648_s3, %s470_s23  ;;  %p476_p9 = scmp.lt.u32.totalorder %s470_s23, %s648_s3 }
 0x173   : > { %p472_p5 = pnand %p471_p2, %p611_p4 }
 0x175   : > { %p473_p7 = pneg %p472_p5 }
 0x177   : > { %p478_p8 = pnand %p476_p9, %p473_p7 }
 0x179   : > { %481 = shalt.err (!%p478_p8)
}
 0x17a   : > { %381 = dma.vmem_to_hbm [thread:$0]  (%p611_p4), %s294_s20, 64, %s648_s3, [#allocation7]  }
 0x17b PF: > { %p395_p3 = scmp.ge.s32.totalorder %s512_s14, 2  ;;  %p396_p6 = scmp.eq.s32.totalorder %s363_s16, 1 }
 0x17d   : > { %p389_p10 = pnand %p396_p6, %p395_p3 }
 0x17f   : > { %499 = dma.done.wait (!%p389_p10), [#allocation7], 64  }
 0x180   : > { %501 = vsyncadd (!%p389_p10), [#allocation7], 4294967232  ;;  %s17_s14 = sadd.s32 1, %s512_s14   ;;  %s658_s12 = smov %s508_s13 }
 0x181   : > { %p14_p11 = scmp.ge.s32.totalorder %s17_s14, 4   ;;  %s659_s13 = smov %s661_s17 }
 0x183   :  { %16 = sbr.rel (!%p14_p11) target bundleno = 4 (0x4), region = 86 }
 0x18a   :  { %311 = vsyncpa [#allocation6], 1 }
 0x18b   :  { %313 = vsyncpa [#allocation6 + $0x1], 1 }
 0x18c   :  { %314 = vsyncpa [#allocation7], 1 }
 0x18d   :  { %316 = vsyncpa [#allocation7 + $0x1], 1 }

</bundles_post_ra>
